<compile_context>
chip_gen: v6e
topology: v6e:2x2x1
jax: 0.10.0
libtpu: 0.0.40
codegen_flags: <defaults>
</compile_context>

<pallas_src>
import jax
import jax.numpy as jnp
from jax.experimental import pallas as pl
from jax.experimental.pallas import tpu as pltpu

SQRT1_2 = 0.7071067811865476


def _erf(x):
    # Abramowitz & Stegun 7.1.26 (max abs err ~1.5e-7) -> exact-GELU semantics
    # without relying on an erf lowering in Mosaic (exp/mul/add/select only).
    a1, a2, a3, a4, a5 = (0.254829592, -0.284496736, 1.421413741,
                          -1.453152027, 1.061405429)
    p = 0.3275911
    s = jnp.where(x >= 0, 1.0, -1.0)
    ax = jnp.abs(x)
    t = pl.reciprocal(1.0 + p * ax, approx=False)   # exact; keeps 1e-7 accuracy
    poly = ((((a5 * t + a4) * t + a3) * t + a2) * t + a1) * t
    return s * (1.0 - poly * jnp.exp(-ax * ax))


def _gelu_exact(x):
    return 0.5 * x * (1.0 + _erf(x * SQRT1_2))


def gafn_kernel(x_ref, c_ref, wqv_ref, wcat_ref, bvec_ref, ba_ref, out_ref):
    nb, C, D = x_ref.shape
    M = nb * C

    # Flatten batch+token dims so the shared-weight matmuls see M = nb*C rows.
    # Layout-cheap: C is sublane-aligned (multiple of 8), D stays on lanes.
    x2 = x_ref[...].reshape(M, D)
    c2 = c_ref[...].reshape(M, D)

    bq = bvec_ref[0:1, :]          # (1, D)
    bv = bvec_ref[1:2, :]
    bc = bvec_ref[2:3, :]
    wa = bvec_ref[3:4, :]
    ba = ba_ref[0]                 # scalar attn bias, read from SMEM

    # q_proj2(centroids), v_proj2(x)   (dropout2 on centroids = identity, eval)
    q = jnp.dot(c2, wqv_ref[0], preferred_element_type=jnp.float32) + bq
    v = jnp.dot(x2, wqv_ref[1], preferred_element_type=jnp.float32) + bv

    # cat2(concat([v, q*v], -1)) as a single K = 2D matmul.
    hv = jnp.concatenate([v, q * v], axis=-1)                       # (M, 2D)
    h = jnp.dot(hv, wcat_ref[...], preferred_element_type=jnp.float32) + bc
    h = _gelu_exact(h)

    # attn2: (M, D) -> (M, 1) logits, softmax over the token axis (torch dim=1)
    logits = (jnp.sum(h * wa, axis=-1, keepdims=True) + ba).reshape(nb, C, 1)
    m = jnp.max(logits, axis=1, keepdims=True)
    e = jnp.exp(logits - m)
    denom = jnp.sum(e, axis=1, keepdims=True)
    # EUP approx reciprocal + one Newton refinement on the tiny (nb,1,1) array:
    # divide stays off the VALU while retaining ~f32 accuracy.
    r = pl.reciprocal(denom, approx=True)
    r = r * (2.0 - denom * r)
    attn = e * r

    out_ref[...] = (attn * x_ref[...]).astype(out_ref.dtype)


def pack_params(Wq, bq, Wv, bv, Wcat, bcat, Wattn, battn):
    """Pack torch-layout weights into the (consolidated) kernel operands."""
    w_qv = jnp.stack([Wq.T, Wv.T], axis=0)                 # (2, D, D)
    w_cat = Wcat.T                                         # (2D, D)
    bvec = jnp.stack([bq, bv, bcat, Wattn[0]], axis=0)     # (4, D)
    ba = battn.reshape(1).astype(jnp.float32)              # (1,)  -> SMEM
    return w_qv, w_cat, bvec, ba


def gafn_v3_cluster_forward(x, centroids, packed, block_rows=8):
    N, C, D = x.shape
    w_qv, w_cat, bvec, ba = packed

    nb = min(block_rows, N)
    # Keep >= 2 grid steps when N allows so both v7x TensorCores get work.
    if N >= 2 and pl.cdiv(N, nb) < 2:
        nb = pl.cdiv(N, 2)
    n_pad = pl.cdiv(N, nb) * nb
    if n_pad != N:
        pad = ((0, n_pad - N), (0, 0), (0, 0))
        x_in = jnp.pad(x, pad)
        c_in = jnp.pad(centroids, pad)
    else:
        x_in, c_in = x, centroids

    batched = pl.BlockSpec((nb, C, D), lambda g: (g, 0, 0))

    def resident(shape):
        nd = len(shape)
        return pl.BlockSpec(shape, lambda g, _nd=nd: (0,) * _nd)

    out = pl.pallas_call(
        gafn_kernel,
        out_shape=jax.ShapeDtypeStruct((n_pad, C, D), x.dtype),
        grid=(n_pad // nb,),
        in_specs=[
            batched,                                           # x
            batched,                                           # centroids
            resident(w_qv.shape),                              # stacked Wq^T/Wv^T
            resident(w_cat.shape),                             # cat2 W^T (2D, D)
            resident(bvec.shape),                              # [bq;bv;bcat;w_attn]
            pl.BlockSpec(memory_space=pltpu.MemorySpace.SMEM),  # attn bias scalar
        ],
        out_specs=batched,
        compiler_params=pltpu.CompilerParams(
            dimension_semantics=("parallel",)),
    )(x_in, c_in, w_qv, w_cat, bvec, ba)
    return out[:N]


def reference(x, centroids, torch_params):
    # Pure-JAX reference matching the PyTorch forward (eval mode).
    Wq, bq, Wv, bv, Wcat, bcat, Wattn, battn = torch_params
    q = centroids @ Wq.T + bq
    v = x @ Wv.T + bv
    cat = jnp.concatenate([v, q * v], axis=-1)
    h = cat @ Wcat.T + bcat
    h = jax.nn.gelu(h, approximate=False)    # nn.GELU() default = exact erf
    logits = h @ Wattn.T + battn             # (N, C, 1)
    attn = jax.nn.softmax(logits, axis=1)
    return attn * x


if __name__ == "__main__":
    key = jax.random.PRNGKey(0)
    N, C, D = 4, 16, 32           # batch, tokens, module_dim
    row_total = 24                # cluster rows (>= C)

    keys = jax.random.split(key, 12)
    x = jax.random.normal(keys[0], (N, C, D), jnp.float32)
    cluster = jax.random.normal(keys[1], (N, row_total, D), jnp.float32)

    # TODO(synk): the PyTorch module reshuffles rows with np.random.shuffle on
    # every forward call; a fixed permutation stands in here (host-side glue).
    row_perm = jax.random.permutation(keys[2], row_total)
    centroids = cluster[:, row_perm[:C], :]

    scale = 0.05
    Wq = scale * jax.random.normal(keys[3], (D, D), jnp.float32)
    bq = scale * jax.random.normal(keys[4], (D,), jnp.float32)
    Wv = scale * jax.random.normal(keys[5], (D, D), jnp.float32)
    bv = scale * jax.random.normal(keys[6], (D,), jnp.float32)
    Wcat = scale * jax.random.normal(keys[7], (D, 2 * D), jnp.float32)
    bcat = scale * jax.random.normal(keys[8], (D,), jnp.float32)
    Wattn = scale * jax.random.normal(keys[9], (1, D), jnp.float32)
    battn = scale * jax.random.normal(keys[10], (1,), jnp.float32)

    packed = pack_params(Wq, bq, Wv, bv, Wcat, bcat, Wattn, battn)

    out = gafn_v3_cluster_forward(x, centroids, packed, block_rows=8)
    out = jax.block_until_ready(out)

    ref = reference(x, centroids, (Wq, bq, Wv, bv, Wcat, bcat, Wattn, battn))
    assert out.shape == (N, C, D)
    max_err = float(jnp.max(jnp.abs(out - ref)))
    # Tolerance leaves margin for the Newton-refined EUP reciprocal in the
    # softmax and the A&S erf polynomial (~1.5e-7 abs).
    assert jnp.allclose(out, ref, atol=1e-4, rtol=1e-4), max_err
    print("KERNEL_OK")
</pallas_src>

<mosaic_0001>
module attributes {stable_mosaic.version = 11 : i64} {
  func.func @gafn_kernel(%arg0: i32, %arg1: memref<2x16x32xf32, #tpu.memory_space<vmem>>, %arg2: memref<2x16x32xf32, #tpu.memory_space<vmem>>, %arg3: memref<2x32x32xf32, #tpu.memory_space<vmem>>, %arg4: memref<64x32xf32, #tpu.memory_space<vmem>>, %arg5: memref<4x32xf32, #tpu.memory_space<vmem>>, %arg6: memref<1xf32, #tpu.memory_space<smem>>, %arg7: memref<2x16x32xf32, #tpu.memory_space<vmem>>) attributes {dimension_semantics = [#tpu.dimension_semantics<parallel>], iteration_bounds = array<i64: 2>, scalar_prefetch = 0 : i64, scratch_operands = 0 : i64, tpu.core_type = #tpu.core_type<tc>, window_params = [{transform_indices = @transform_0, window_bounds = array<i64: 2, 16, 32>}, {transform_indices = @transform_1, window_bounds = array<i64: 2, 16, 32>}, {pipeline_mode = #tpu.pipeline_mode<synchronous>, transform_indices = @transform_2, window_bounds = array<i64: 2, 32, 32>}, {pipeline_mode = #tpu.pipeline_mode<synchronous>, transform_indices = @transform_3, window_bounds = array<i64: 64, 32>}, {pipeline_mode = #tpu.pipeline_mode<synchronous>, transform_indices = @transform_4, window_bounds = array<i64: 4, 32>}, {transform_indices = @transform_5, window_bounds = array<i64: 1>}, {transform_indices = @transform_6, window_bounds = array<i64: 2, 16, 32>}]} {
    %c0 = arith.constant 0 : index
    %c0_0 = arith.constant 0 : index
    %c0_1 = arith.constant 0 : index
    %0 = vector.load %arg1[%c0, %c0_0, %c0_1] : memref<2x16x32xf32, #tpu.memory_space<vmem>>, vector<2x16x32xf32>
    %1 = vector.shape_cast %0 : vector<2x16x32xf32> to vector<32x32xf32>
    %c0_2 = arith.constant 0 : index
    %c0_3 = arith.constant 0 : index
    %c0_4 = arith.constant 0 : index
    %2 = vector.load %arg2[%c0_2, %c0_3, %c0_4] : memref<2x16x32xf32, #tpu.memory_space<vmem>>, vector<2x16x32xf32>
    %3 = vector.shape_cast %2 : vector<2x16x32xf32> to vector<32x32xf32>
    %c0_5 = arith.constant 0 : index
    %c0_6 = arith.constant 0 : index
    %4 = vector.load %arg5[%c0_5, %c0_6] : memref<4x32xf32, #tpu.memory_space<vmem>>, vector<1x32xf32>
    %c1 = arith.constant 1 : index
    %c0_7 = arith.constant 0 : index
    %5 = vector.load %arg5[%c1, %c0_7] : memref<4x32xf32, #tpu.memory_space<vmem>>, vector<1x32xf32>
    %c2 = arith.constant 2 : index
    %c0_8 = arith.constant 0 : index
    %6 = vector.load %arg5[%c2, %c0_8] : memref<4x32xf32, #tpu.memory_space<vmem>>, vector<1x32xf32>
    %c3 = arith.constant 3 : index
    %c0_9 = arith.constant 0 : index
    %7 = vector.load %arg5[%c3, %c0_9] : memref<4x32xf32, #tpu.memory_space<vmem>>, vector<1x32xf32>
    %c0_10 = arith.constant 0 : index
    %8 = memref.load %arg6[%c0_10] : memref<1xf32, #tpu.memory_space<smem>>
    %c0_11 = arith.constant 0 : index
    %c0_12 = arith.constant 0 : index
    %c0_13 = arith.constant 0 : index
    %9 = vector.load %arg3[%c0_11, %c0_12, %c0_13] : memref<2x32x32xf32, #tpu.memory_space<vmem>>, vector<1x32x32xf32>
    %10 = vector.shape_cast %9 : vector<1x32x32xf32> to vector<32x32xf32>
    %cst = arith.constant dense<0.000000e+00> : vector<32x32xf32>
    %11 = tpu.matmul %3, %10, %cst {dimension_numbers = #tpu.dot_dimension_numbers<[1], [0], [0], [1], [0, 0, 1, 1], [], []>} : vector<32x32xf32>, vector<32x32xf32>, vector<32x32xf32> -> vector<32x32xf32>
    %12 = vector.broadcast %4 : vector<1x32xf32> to vector<32x32xf32>
    %13 = arith.addf %11, %12 : vector<32x32xf32>
    %c1_14 = arith.constant 1 : index
    %c0_15 = arith.constant 0 : index
    %c0_16 = arith.constant 0 : index
    %14 = vector.load %arg3[%c1_14, %c0_15, %c0_16] : memref<2x32x32xf32, #tpu.memory_space<vmem>>, vector<1x32x32xf32>
    %15 = vector.shape_cast %14 : vector<1x32x32xf32> to vector<32x32xf32>
    %cst_17 = arith.constant dense<0.000000e+00> : vector<32x32xf32>
    %16 = tpu.matmul %1, %15, %cst_17 {dimension_numbers = #tpu.dot_dimension_numbers<[1], [0], [0], [1], [0, 0, 1, 1], [], []>} : vector<32x32xf32>, vector<32x32xf32>, vector<32x32xf32> -> vector<32x32xf32>
    %17 = vector.broadcast %5 : vector<1x32xf32> to vector<32x32xf32>
    %18 = arith.addf %16, %17 : vector<32x32xf32>
    %19 = arith.mulf %13, %18 : vector<32x32xf32>
    %20 = tpu.concatenate %18, %19 in 1 : vector<32x32xf32>, vector<32x32xf32> -> vector<32x64xf32>
    %c0_18 = arith.constant 0 : index
    %c0_19 = arith.constant 0 : index
    %21 = vector.load %arg4[%c0_18, %c0_19] : memref<64x32xf32, #tpu.memory_space<vmem>>, vector<64x32xf32>
    %cst_20 = arith.constant dense<0.000000e+00> : vector<32x32xf32>
    %22 = tpu.matmul %20, %21, %cst_20 {dimension_numbers = #tpu.dot_dimension_numbers<[1], [0], [0], [1], [0, 0, 1, 1], [], []>} : vector<32x64xf32>, vector<64x32xf32>, vector<32x32xf32> -> vector<32x32xf32>
    %23 = vector.broadcast %6 : vector<1x32xf32> to vector<32x32xf32>
    %24 = arith.addf %22, %23 : vector<32x32xf32>
    %cst_21 = arith.constant 5.000000e-01 : f32
    %25 = vector.broadcast %cst_21 : f32 to vector<32x32xf32>
    %26 = arith.mulf %25, %24 : vector<32x32xf32>
    %cst_22 = arith.constant 0.707106769 : f32
    %27 = vector.broadcast %cst_22 : f32 to vector<32x32xf32>
    %28 = arith.mulf %24, %27 : vector<32x32xf32>
    %cst_23 = arith.constant 0.000000e+00 : f32
    %29 = vector.broadcast %cst_23 : f32 to vector<32x32xf32>
    %30 = arith.cmpf oge, %28, %29 : vector<32x32xf32>
    %cst_24 = arith.constant 1.000000e+00 : f32
    %cst_25 = arith.constant -1.000000e+00 : f32
    %31 = vector.broadcast %cst_24 : f32 to vector<32x32xf32>
    %32 = vector.broadcast %cst_25 : f32 to vector<32x32xf32>
    %33 = arith.select %30, %31, %32 : vector<32x32xi1>, vector<32x32xf32>
    %34 = math.absf %28 : vector<32x32xf32>
    %cst_26 = arith.constant 0.327591091 : f32
    %35 = vector.broadcast %cst_26 : f32 to vector<32x32xf32>
    %36 = arith.mulf %35, %34 : vector<32x32xf32>
    %cst_27 = arith.constant 1.000000e+00 : f32
    %37 = vector.broadcast %cst_27 : f32 to vector<32x32xf32>
    %38 = arith.addf %37, %36 : vector<32x32xf32>
    %39 = tpu.reciprocal %38 : vector<32x32xf32> -> vector<32x32xf32>
    %cst_28 = arith.constant 1.06140542 : f32
    %40 = vector.broadcast %cst_28 : f32 to vector<32x32xf32>
    %41 = arith.mulf %40, %39 : vector<32x32xf32>
    %cst_29 = arith.constant -1.45315206 : f32
    %42 = vector.broadcast %cst_29 : f32 to vector<32x32xf32>
    %43 = arith.addf %41, %42 : vector<32x32xf32>
    %44 = arith.mulf %43, %39 : vector<32x32xf32>
    %cst_30 = arith.constant 1.42141378 : f32
    %45 = vector.broadcast %cst_30 : f32 to vector<32x32xf32>
    %46 = arith.addf %44, %45 : vector<32x32xf32>
    %47 = arith.mulf %46, %39 : vector<32x32xf32>
    %cst_31 = arith.constant -0.284496725 : f32
    %48 = vector.broadcast %cst_31 : f32 to vector<32x32xf32>
    %49 = arith.addf %47, %48 : vector<32x32xf32>
    %50 = arith.mulf %49, %39 : vector<32x32xf32>
    %cst_32 = arith.constant 0.254829586 : f32
    %51 = vector.broadcast %cst_32 : f32 to vector<32x32xf32>
    %52 = arith.addf %50, %51 : vector<32x32xf32>
    %53 = arith.mulf %52, %39 : vector<32x32xf32>
    %cst_33 = arith.constant 0.000000e+00 : f32
    %54 = vector.broadcast %cst_33 : f32 to vector<32x32xf32>
    %55 = arith.subf %54, %34 : vector<32x32xf32>
    %56 = arith.mulf %55, %34 : vector<32x32xf32>
    %57 = math.exp %56 : vector<32x32xf32>
    %58 = arith.mulf %53, %57 : vector<32x32xf32>
    %cst_34 = arith.constant 1.000000e+00 : f32
    %59 = vector.broadcast %cst_34 : f32 to vector<32x32xf32>
    %60 = arith.subf %59, %58 : vector<32x32xf32>
    %61 = arith.mulf %33, %60 : vector<32x32xf32>
    %cst_35 = arith.constant 1.000000e+00 : f32
    %62 = vector.broadcast %cst_35 : f32 to vector<32x32xf32>
    %63 = arith.addf %62, %61 : vector<32x32xf32>
    %64 = arith.mulf %26, %63 : vector<32x32xf32>
    %65 = vector.broadcast %7 : vector<1x32xf32> to vector<32x32xf32>
    %66 = arith.mulf %64, %65 : vector<32x32xf32>
    %cst_36 = arith.constant dense<0.000000e+00> : vector<32xf32>
    %67 = vector.multi_reduction <add>, %66, %cst_36 [1] : vector<32x32xf32> to vector<32xf32>
    %68 = vector.shape_cast %67 : vector<32xf32> to vector<32x1xf32>
    %69 = vector.broadcast %8 : f32 to vector<32x1xf32>
    %70 = arith.addf %68, %69 : vector<32x1xf32>
    %71 = vector.shape_cast %70 : vector<32x1xf32> to vector<2x16x1xf32>
    %cst_37 = arith.constant dense<0xFF800000> : vector<2x1xf32>
    %72 = vector.multi_reduction <maximumf>, %71, %cst_37 [1] : vector<2x16x1xf32> to vector<2x1xf32>
    %73 = vector.shape_cast %72 : vector<2x1xf32> to vector<2x1x1xf32>
    %74 = vector.broadcast %73 : vector<2x1x1xf32> to vector<2x16x1xf32>
    %75 = arith.subf %71, %74 : vector<2x16x1xf32>
    %76 = math.exp %75 : vector<2x16x1xf32>
    %cst_38 = arith.constant dense<0.000000e+00> : vector<2x1xf32>
    %77 = vector.multi_reduction <add>, %76, %cst_38 [1] : vector<2x16x1xf32> to vector<2x1xf32>
    %78 = vector.shape_cast %77 : vector<2x1xf32> to vector<2x1x1xf32>
    %79 = tpu.reciprocal %78 {approx = true} : vector<2x1x1xf32> -> vector<2x1x1xf32>
    %80 = arith.mulf %78, %79 : vector<2x1x1xf32>
    %cst_39 = arith.constant 2.000000e+00 : f32
    %81 = vector.broadcast %cst_39 : f32 to vector<2x1x1xf32>
    %82 = arith.subf %81, %80 : vector<2x1x1xf32>
    %83 = arith.mulf %79, %82 : vector<2x1x1xf32>
    %84 = vector.broadcast %83 : vector<2x1x1xf32> to vector<2x16x1xf32>
    %85 = arith.mulf %76, %84 : vector<2x16x1xf32>
    %c0_40 = arith.constant 0 : index
    %c0_41 = arith.constant 0 : index
    %c0_42 = arith.constant 0 : index
    %86 = vector.load %arg1[%c0_40, %c0_41, %c0_42] : memref<2x16x32xf32, #tpu.memory_space<vmem>>, vector<2x16x32xf32>
    %87 = vector.broadcast %85 : vector<2x16x1xf32> to vector<2x16x32xf32>
    %88 = arith.mulf %87, %86 : vector<2x16x32xf32>
    %c0_43 = arith.constant 0 : index
    %c0_44 = arith.constant 0 : index
    %c0_45 = arith.constant 0 : index
    %89 = vector.load %arg7[%c0_43, %c0_44, %c0_45] : memref<2x16x32xf32, #tpu.memory_space<vmem>>, vector<2x16x32xf32>
    tpu.vector_store %arg7[%c0_43, %c0_44, %c0_45], %88 {strides = array<i32>} : memref<2x16x32xf32, #tpu.memory_space<vmem>>, vector<2x16x32xf32>,
    return
  }
  func.func @transform_0(%arg0: i32) -> (i32, i32, i32) {
    %c0_i32 = arith.constant 0 : i32
    %c0_i32_0 = arith.constant 0 : i32
    %c0_i32_1 = arith.constant 0 : i32
    return %arg0, %c0_i32, %c0_i32_0 : i32, i32, i32
  }
  func.func @transform_1(%arg0: i32) -> (i32, i32, i32) {
    %c0_i32 = arith.constant 0 : i32
    %c0_i32_0 = arith.constant 0 : i32
    %c0_i32_1 = arith.constant 0 : i32
    return %arg0, %c0_i32, %c0_i32_0 : i32, i32, i32
  }
  func.func @transform_2(%arg0: i32) -> (i32, i32, i32) {
    %c0_i32 = arith.constant 0 : i32
    %c0_i32_0 = arith.constant 0 : i32
    %c0_i32_1 = arith.constant 0 : i32
    %c0_i32_2 = arith.constant 0 : i32
    return %c0_i32, %c0_i32_0, %c0_i32_1 : i32, i32, i32
  }
  func.func @transform_3(%arg0: i32) -> (i32, i32) {
    %c0_i32 = arith.constant 0 : i32
    %c0_i32_0 = arith.constant 0 : i32
    %c0_i32_1 = arith.constant 0 : i32
    return %c0_i32, %c0_i32_0 : i32, i32
  }
  func.func @transform_4(%arg0: i32) -> (i32, i32) {
    %c0_i32 = arith.constant 0 : i32
    %c0_i32_0 = arith.constant 0 : i32
    %c0_i32_1 = arith.constant 0 : i32
    return %c0_i32, %c0_i32_0 : i32, i32
  }
  func.func @transform_5(%arg0: i32) -> i32 {
    %c0_i32 = arith.constant 0 : i32
    %c0_i32_0 = arith.constant 0 : i32
    return %c0_i32 : i32
  }
  func.func @transform_6(%arg0: i32) -> (i32, i32, i32) {
    %c0_i32 = arith.constant 0 : i32
    %c0_i32_0 = arith.constant 0 : i32
    %c0_i32_1 = arith.constant 0 : i32
    return %arg0, %c0_i32, %c0_i32_0 : i32, i32, i32
  }
}

</mosaic_0001>

<bundles_post_ra>
// kernel: tpu_custom_call.1
= control target key start
LH: loop header
LB: loop body
LE: loop exit
PB: predicated region body
PF: predicated region fallthrough
CT: control target
= control target key end

     0   :  { %s1655_s0 = inlined_call_operand.vmem [shape: f32[4,16,32], index: 0, kind: input, shape index: {}]   ;;  %s1656_s1 = inlined_call_operand.hbm [shape: f32[4,16,32], index: 1, kind: input, shape index: {}]   ;;  %s1657_s2 = inlined_call_operand.hbm [shape: f32[2,32,32], index: 2, kind: input, shape index: {}]   ;;  %s1658_s3 = inlined_call_operand.vmem [shape: f32[64,32], index: 3, kind: input, shape index: {}]   ;;  %s1659_s4 = inlined_call_operand.vmem [shape: f32[4,32], index: 4, kind: input, shape index: {}]   ;;  %s1660_s5 = inlined_call_operand.<no memory space> [shape: f32[1], index: 5, kind: input, shape index: {}]   ;;  %s1661_s6 = inlined_call_operand.hbm [shape: f32[4,16,32], index: 6, kind: output, shape index: {}]  }
   0x1   :  { %11 = sst [smem:[#allocation2]] %s1660_s5 }
   0x2   :  { %12 = vsyncpa [#allocation4], 0 }
   0x3   :  { %14 = vsyncpa [#allocation4 + $0x1], 0 }
   0x4   :  { %15 = vsyncpa [#allocation7], 0 }
   0x5   :  { %16 = vsyncpa [#allocation5], 0 }
   0x6   :  { %18 = vsyncpa [#allocation5 + $0x1], 0  ;;  %s1354_s23 = smov 0   ;;  %s1356_s24 = smov 0  }
   0x7   :  { %s1358_s25 = smov 0   ;;  %s1360_s26 = smov 0  }
   0x8 LB: > { %s1375_s5 = sadd.s32 4294967295, %s1305_s26   ;;  %s972_s27 = sadd.s32 4294967294, %s1305_s26   ;;  %s1305_s26 = sphi %s1360_s26, %s1685_s26   ;;  %s1301_s25 = sphi %s1358_s25, %s1684_s25   ;;  %s1297_s24 = sphi %s1356_s24, %s1683_s24   ;;  %s1293_s23 = sphi %s1354_s23, %s1682_s23  }
   0x9   : > { %p70_p0 = scmp.ne.s32.totalorder %s1297_s24, %s1293_s23  ;;  %p1662_p1 = scmp.eq.s32.totalorder %s1375_s5, 0 }
   0xa   : > { %p184_p3 = scmp.eq.s32.totalorder %s972_s27, 1  ;;  %p973_p5 = scmp.ge.s32.totalorder %s1305_s26, 1 }
   0xb   : > { %p1384_p4 = por %p1662_p1, %p70_p0  ;;  %p191_p7 = scmp.lt.s32.totalorder %s1305_s26, 3 }
   0xc   : > { %p1389_p6 = por %p184_p3, %p70_p0  ;;  %s1307_s7 = smov [#allocation6]  }
   0xd   : > { %s1667_s28 = scalar_select %p1384_p4, 1, 0 }
   0xe   : > { %s1668_s29 = scalar_select %p1389_p6, 1, 0 }
   0xf   : > { %p1394_p8 = pnand %p973_p5, %p191_p7  ;;  %s203_s8 = sshll.u32 %s1307_s7, 4  ;;  %s204_s8 = int_to_ptr.vmem [resolvable:$true] %s203_s8 }
  0x10   : > { %s1408_s10 = sadd.s32 1, %s1305_s26   ;;  %s57_s11 = sadd.s32 1, %s1301_s25 }
  0x11   : > { %s1669_s30 = scalar_select %p1394_p8, 1, 0 }
  0x12   : > { %p1100_p9 = pneg %p1394_p8  ;;  %s54_s12 = ssub.s32 %s1305_s26, %s1408_s10 }
  0x13   : > { %s1194_s13 = scalar_lea.vmem %s204_s8, 1024  ;;  %p1202_p5 = scmp.lt.s32.totalorder %s204_s8, %s204_s8 }
  0x14   : > { %p1403_p11 = pnand %p1100_p9, %p1662_p1  ;;  %p1195_p13 = scmp.ne.s32.totalorder %s204_s8, %s1194_s13 }
  0x15   : > { %p1203_p7 = scmp.lt.s32.totalorder %s1194_s13, %s1194_s13 }
  0x16   : > { %p1185_p12 = pneg %p1403_p11 }
  0x17   : > { %p1204_p10 = por %p1203_p7, %p1202_p5 }
  0x18   : > { %p1197_p0 = pnand %p1195_p13, %p1185_p12 }
  0x1a   : > { %p1198_p3 = pneg %p1197_p0 }
  0x1c   : > { %p1205_p2 = pnand %p1204_p10, %p1198_p3 }
  0x1e   : > { %1208 = shalt.err (!%p1205_p2)
}
  0x1f   : > { %s1663_s14 = smov 128   ;;  %s1309_s15 = smov 8  }
  0x20   : > { %1103 = dma.hbm_to_vmem [thread:$0]  (!%p1403_p11), %s1657_s2, 1024, %s204_s8, [#allocation7], %s1663_s14, %s1663_s14, %s1309_s15  }
  0x21   : > { %p55_p2 = scmp.eq.s32.totalorder %s54_s12, 0  ;;  %p64_p9 = scmp.ne.s32.totalorder %s1301_s25, %s1297_s24 }
  0x22   : > { %p65_p10 = scmp.eq.s32.totalorder %s1305_s26, 0  ;;  %p1113_p12 = scmp.lt.s32.totalorder %s1305_s26, 2 }
  0x23   : > { %s1428_s18 = scalar_select %p55_p2, %s1301_s25, %s57_s11  }
  0x24   : > { %p66_p13 = por %p65_p10, %p64_p9  ;;  %p1671_p0 = scmp.eq.s32.totalorder %s1375_s5, 1 }
  0x25   : > { %s236_s20 = sand.u32 1, %s1301_s25   ;;  %s1010_s21 = sshll.u32 %s1305_s26, 9 }
  0x26   : > { %p1432_p3 = por %p1671_p0, %p64_p9  ;;  %s976_s22 = sshll.u32 %s236_s20, 5 }
  0x27   : > { %s1441_s9 = scalar_lea.hbm %s1656_s1, %s1010_s21  ;;  %s240_s8 = scalar_lea.vmem [#allocation3], %s976_s22 }
  0x28   : > { %s1672_s19 = scalar_select %p1432_p3, 1, 0 }
  0x29   : > { %s248_s11 = sshll.u32 %s240_s8, 4  ;;  %p1443_p11 = pnand %p1113_p12, %p66_p13  ;;  %s1447_s11 = int_to_ptr.vmem [resolvable:$true] %s248_s11 }
  0x2a   : > { %s1449_s13 = scalar_lea.sflag [#allocation4], %s236_s20  ;;  %s1209_s16 = scalar_lea.hbm %s1441_s9, 512 }
  0x2b   : > { %p1210_p5 = scmp.ne.s32.totalorder %s1441_s9, %s1209_s16  ;;  %p1211_p7 = pneg %p1443_p11 }
  0x2c   : > { %s1214_s22 = scalar_lea.hbm %s1656_s1, 1024  ;;  %p1215_p10 = scmp.lt.s32.totalorder %s1441_s9, %s1656_s1 }
  0x2d   : > { %p1212_p2 = pnand %p1211_p7, %p1210_p5  ;;  %p1216_p12 = scmp.lt.s32.totalorder %s1214_s22, %s1209_s16 }
  0x2f   : > { %p1213_p9 = pneg %p1212_p2  ;;  %p1217_p13 = por %p1216_p12, %p1215_p10 }
  0x31   : > { %p1218_p0 = pnand %p1217_p13, %p1213_p9 }
  0x33   : > { %1221 = shalt.err (!%p1218_p0)
}
  0x34   : > { %s1222_s20 = scalar_lea.vmem %s1447_s11, 512  ;;  %s1310_s8 = smov [#allocation3]  }
  0x35   : > { %p1223_p1 = scmp.ne.s32.totalorder %s1447_s11, %s1222_s20  ;;  %s1227_s14 = sshll.u32 %s1310_s8, 4  ;;  %s1228_s14 = int_to_ptr.vmem [resolvable:$false] %s1227_s14 }
  0x36   : > { %s1229_s17 = scalar_lea.vmem %s1228_s14, 1024  ;;  %p1230_p2 = scmp.lt.s32.totalorder %s1447_s11, %s1228_s14 }
  0x37   : > { %p1225_p6 = pnand %p1223_p1, %p1211_p7  ;;  %p1231_p3 = scmp.lt.s32.totalorder %s1229_s17, %s1222_s20 }
  0x39   : > { %p1226_p5 = pneg %p1225_p6  ;;  %p1232_p4 = por %p1231_p3, %p1230_p2 }
  0x3b   : > { %p1233_p8 = pnand %p1232_p4, %p1226_p5 }
  0x3d   : > { %1236 = shalt.err (!%p1233_p8)
}
  0x3e   : > { %s1674_s16 = smov 128   ;;  %p1675_p1 = scmp.ne.s32.totalorder %s1669_s30, 0 }
  0x3f   : > { %1107 = dma.hbm_to_vmem [thread:$0]  (!%p1443_p11), %s1441_s9, 512, %s1447_s11, %s1449_s13, %s1674_s16, %s1674_s16, %s1309_s15  }
  0x40   : > { %260 = sbr.rel (%p1675_p1) target bundleno = 893 (0x37d), region = 44  ;;  %s1476_s21 = sand.u32 (!%p1675_p1), 1, %s1297_s24  }
  0x41   : > { %s981_s14 = sshll.u32 (!%p1675_p1), %s1476_s21, 5  ;;  %s263_s22 = scalar_lea.sflag (!%p1675_p1), [#allocation4], %s1476_s21 }
  0x42   : > { %s1482_s12 = scalar_lea.vmem (!%p1675_p1), [#allocation3], %s981_s14  ;;  %p1676_p4 = scmp.ne.s32.totalorder (!%p1675_p1), %s1667_s28, 0 }
  0x45   : > { %1280 = dma.done.wait (%p1676_p4), %s263_s22, 512  }
  0x46   : > { %1282 = vsyncadd (%p1676_p4), %s263_s22, 4294966784  ;;  %p1677_p6 = scmp.eq.s32.totalorder %s1375_s5, 0 }
  0x48   : > { %1284 = dma.done.wait (%p1677_p6), [#allocation7], 1024   ;;  %p1678_p8 = pmov %p1677_p6 }
  0x49   : > { %s984_s30 = sshll.u32 %s1375_s5, 1  ;;  %vm335_vm0 = vcmask 261120   ;;  %v330_v0 = vld [vmem:[#allocation6 + $0x18] sm:$0xff]  ;;  %v329_v1 = vld [vmem:[#allocation6 + $0x10] sm:$0xff]  ;;  %v318_v2 = vld [vmem:[%s1482_s12] sm:$0xff]  ;;  %s1311_s16 = smov 32  }
  0x4a   : > { %1286 = vsyncadd (%p1678_p8), [#allocation7], 4294966272  ;;  %p306_p3 = scmp.lt.s32.totalorder %s984_s30, 3  ;;  %1042 = vmatprep.subr.mxu1 %v330_v0  ;;  %v328_v3 = vld [vmem:[#allocation6 + $0x8] sm:$0xff]  ;;  %1050 = vmatprep.mubr.msk.f32.mxu1 %vm335_vm0, %v318_v2  ;;  %v327_v4 = vld [vmem:[#allocation6] sm:$0xff]  ;;  %vm575_vm1 = vcmask 523264  }
  0x4b   : > { %1043 = vmatpush3.msra.mxu1 %v330_v0  ;;  %v319_v5 = vld [vmem:[%s1482_s12 + $0x8] sm:$0xff]  ;;  %v437_v6 = vld [vmem:[#allocation6 + $0x38] sm:$0xff]  ;;  %v320_v7 = vld [vmem:[%s1482_s12 + $0x10] sm:$0xff]  ;;  %s326_s15 = sld [smem:[#allocation2]]  ;;  %s304_s9 = scalar_lea.vmem [#allocation8], %s981_s14 }
  0x4c   : > { %s1687_s30 = smov (!%p306_p3, %s984_s30), 3  ;;  %1044 = vmatprep.subr.mxu1 %v329_v1  ;;  %v436_v8 = vld [vmem:[#allocation6 + $0x30] sm:$0xff]  ;;  %v321_v9 = vld [vmem:[%s1482_s12 + $0x18] sm:$0xff]  ;;  %v435_v10 = vld [vmem:[#allocation6 + $0x28] sm:$0xff]  ;;  %s877_s13 = sshll.u32 %s304_s9, 4  ;;  %s1608_s13 = int_to_ptr.vmem [resolvable:$true] %s877_s13 }
  0x4d   : > { %1045 = vmatpush3.msra.mxu1 %v329_v1  ;;  %s1011_s28 = sshll.u32 %s1687_s30, 4  ;;  %v434_v12 = vld [vmem:[#allocation6 + $0x20] sm:$0xff]  ;;  %v570_v16 = vld [vmem:[%s1658_s3 + $0x38] sm:$0xff]  ;;  %v569_v17 = vld [vmem:[%s1658_s3 + $0x30] sm:$0xff]  ;;  %s1237_s14 = scalar_lea.vmem %s1608_s13, 512 }
  0x4e   : > { %1046 = vmatprep.subr.mxu1 %v328_v3  ;;  %s310_s11 = scalar_lea.vmem %s1655_s0, %s1011_s28  ;;  %1070 = vmatprep.subr.mxu0 %v570_v16  ;;  %v568_v18 = vld [vmem:[%s1658_s3 + $0x28] sm:$0xff]  ;;  %v567_v19 = vld [vmem:[%s1658_s3 + $0x20] sm:$0xff]  ;;  %v566_v20 = vld [vmem:[%s1658_s3 + $0x18] sm:$0xff]  ;;  %p1238_p11 = scmp.ne.s32.totalorder %s1608_s13, %s1237_s14 }
  0x4f   : > { %1047 = vmatpush3.msra.mxu1 %v328_v3  ;;  %v1503_v11 = vld [vmem:[%s310_s11] sm:$0xff]  ;;  %v1508_v13 = vld [vmem:[%s310_s11 + $0x8] sm:$0xff]  ;;  %v1510_v14 = vld [vmem:[%s310_s11 + $0x10] sm:$0xff]  ;;  %1071 = vmatpush3.msra.mxu0 %v570_v16  ;;  %p1679_p7 = scmp.ne.s32.totalorder %s1672_s19, 0  ;;  %s1313_s8 = smov [#allocation8]  }
  0x50   : > { %1048 = vmatprep.subr.mxu1 %v327_v4  ;;  %v1516_v15 = vld [vmem:[%s310_s11 + $0x18] sm:$0xff]  ;;  %1072 = vmatprep.subr.mxu0 %v569_v17  ;;  %v565_v21 = vld [vmem:[%s1658_s3 + $0x10] sm:$0xff]  ;;  %v564_v23 = vld [vmem:[%s1658_s3 + $0x8] sm:$0xff]  ;;  %s1013_s11 = sshll.u32 %s1375_s5, 9  ;;  %s863_s5 = scalar_lea.sflag [#allocation5], %s1476_s21 }
  0x51   : > { %1049 = vmatpush3.msra.mxu1 %v327_v4  ;;  %1073 = vmatpush3.msra.mxu0 %v569_v17  ;;  %v563_v25 = vld [vmem:[%s1658_s3] sm:$0xff]  ;;  %s1606_s20 = scalar_lea.hbm %s1661_s6, %s1013_s11  ;;  %p1239_p9 = pnand %p1238_p11, %p1679_p7 }
  0x52   : > { %1051 = vmatmul.mubr.msk.f32.vlgmr.msra.gmra.mxu1 %vm335_vm0, %v319_v5  ;;  %1056 = vmatprep.subr.mxu1 %v437_v6  ;;  %v987_v29 = vld [vmem:[%s1659_s4] ss:$0 sm:$0xff]  ;;  %v992_v30 = vld [vmem:[%s1659_s4 + $0x1] ss:$0 sm:$0xff]  ;;  %v997_v54 = vld [vmem:[%s1659_s4 + $0x2] ss:$0 sm:$0xff] }
  0x53   : > { %1057 = vmatpush3.msra.mxu1 %v437_v6  ;;  %1053 = vmatprep.mubr.msk.f32.mxu1 %vm335_vm0, %v320_v7  ;;  %p1240_p10 = pneg %p1239_p9  ;;  %s1241_s17 = sshll.u32 %s1313_s8, 4  ;;  %s1242_s17 = int_to_ptr.vmem [resolvable:$false] %s1241_s17 }
  0x54   : > { %1058 = vmatprep.subr.mxu1 %v436_v8  ;;  %1074 = vmatprep.subr.mxu0 %v568_v18  ;;  %p1244_p12 = scmp.lt.s32.totalorder %s1608_s13, %s1242_s17 }
  0x55   : > { %1059 = vmatpush3.msra.mxu1 %v436_v8  ;;  %1075 = vmatpush3.msra.mxu0 %v568_v18 }
  0x56   : > { %1054 = vmatmul.mubr.msk.f32.gmra.mxu1 %vm335_vm0, %v321_v9  ;;  %1060 = vmatprep.subr.mxu1 %v435_v10 }
  0x57   : > { %1061 = vmatpush3.msra.mxu1 %v435_v10  ;;  %1064 = vmatprep.mubr.msk.f32.mxu1 %vm335_vm0, %v1503_v11 }
  0x58   : > { %1062 = vmatprep.subr.mxu1 %v434_v12  ;;  %1076 = vmatprep.subr.mxu0 %v567_v19 }
  0x59   : > { %1063 = vmatpush3.msra.mxu1 %v434_v12  ;;  %1077 = vmatpush3.msra.mxu0 %v567_v19 }
  0x5a   : > { %1065 = vmatmul.mubr.msk.f32.vlgmr.msra.gmra.mxu1 %vm335_vm0, %v1508_v13  ;;  %1078 = vmatprep.subr.mxu0 %v566_v20 }
  0x5b   : > { %1067 = vmatprep.mubr.msk.f32.mxu1 %vm335_vm0, %v1510_v14  ;;  %1079 = vmatpush3.msra.mxu0 %v566_v20 }
  0x5c   : > { %1080 = vmatprep.subr.mxu0 %v565_v21 }
  0x5d   : > { %1081 = vmatpush3.msra.mxu0 %v565_v21 }
  0x5e   : > { %1068 = vmatmul.mubr.msk.f32.gmra.mxu1 %vm335_vm0, %v1516_v15  ;;  %1082 = vmatprep.subr.mxu0 %v564_v23 }
  0x5f   : > { %1083 = vmatpush3.msra.mxu0 %v564_v23 }
  0x60   : > { %1084 = vmatprep.subr.mxu0 %v563_v25 }
  0x61   : > { %1085 = vmatpush3.msra.mxu0 %v563_v25 }
 0x112   : > { %v1052_v22 = vpop.f32.mrf.mxu1 }
 0x113   : > { %v420_v38 = vadd.f32 %v1052_v22, %v987_v29 }
 0x114   : > { %v414_v24 = vpop.f32.mrf.mxu1 }
 0x115   : > { %v415_v32 = vadd.f32 %v987_v29, %v414_v24 }
 0x116   : > { %v1055_v26 = vpop.f32.mrf.mxu1 }
 0x117   : > { %v430_v44 = vadd.f32 %v1055_v26, %v987_v29 }
 0x118   : > { %v424_v27 = vpop.f32.mrf.mxu1 }
 0x119   : > { %v425_v39 = vadd.f32 %v987_v29, %v424_v27 }
 0x11a   : > { %v1066_v28 = vpop.f32.mrf.mxu1 }
 0x11b   : > { %v526_v35 = vadd.f32 %v1066_v28, %v992_v30 }
 0x11c   : > { %v520_v31 = vpop.f32.mrf.mxu1 }
 0x11d   : > { %v521_v33 = vadd.f32 %v992_v30, %v520_v31  ;;  %v540_v41 = vmul.f32 %v526_v35, %v420_v38 }
 0x11e   : > { %v1069_v34 = vpop.f32.mrf.mxu1 }
 0x11f   : > { %v539_v36 = vmul.f32 %v521_v33, %v415_v32  ;;  %v536_v42 = vadd.f32 %v1069_v34, %v992_v30 }
 0x120   : > { %v530_v37 = vpop.f32.mrf.mxu1 }
 0x121   : > { %v531_v40 = vadd.f32 %v992_v30, %v530_v37  ;;  %547 = vrot.lane.b32.xlu0 %v539_v36, %s1311_s16  ;;  %v542_v45 = vmul.f32 %v536_v42, %v430_v44 }
 0x123   : > { %v541_v43 = vmul.f32 %v531_v40, %v425_v39 }
 0x125   : > { %551 = vrot.lane.b32.xlu1 %v541_v43, %s1311_s16  ;;  %549 = vrot.lane.b32.xlu0 %v540_v41, %s1311_s16 }
 0x129   : > { %553 = vrot.lane.b32.xlu1 %v542_v45, %s1311_s16  ;;  %s1243_s16 = scalar_lea.vmem %s1242_s17, 1024 }
 0x12a   : > { %p1245_p13 = scmp.lt.s32.totalorder %s1243_s16, %s1237_s14 }
 0x12c   : > { %p1246_p0 = por %p1245_p13, %p1244_p12 }
 0x12e   : > { %p1247_p5 = pnand %p1246_p0, %p1240_p10 }
 0x193   : > { %v548_v46 = vpop.permute.xlu0 %547 }
 0x194   : > { %v559_v47 = vsel %vm335_vm0, %v521_v33, %v548_v46 }
 0x195   : > { %1086 = vmatprep.mubr.msk.f32.mxu0 %vm575_vm1, %v559_v47 }
 0x197   : > { %v552_v48 = vpop.permute.xlu1 %551  ;;  %v550_v49 = vpop.permute.xlu0 %549 }
 0x198   : > { %v561_v50 = vsel %vm335_vm0, %v531_v40, %v552_v48  ;;  %v560_v51 = vsel %vm335_vm0, %v526_v35, %v550_v49 }
 0x199   : > { %1087 = vmatmul.mubr.msk.f32.vlgmr.msra.gmra.mxu0 %vm575_vm1, %v560_v51 }
 0x19a   : > { %1089 = vmatprep.mubr.msk.f32.mxu0 %vm575_vm1, %v561_v50 }
 0x19b   : > { %v554_v52 = vpop.permute.xlu1 %553 }
 0x19c   : > { %v562_v53 = vsel %vm335_vm0, %v536_v42, %v554_v52 }
 0x19d   : > { %1090 = vmatmul.mubr.msk.f32.gmra.mxu0 %vm575_vm1, %v562_v53 }
 0x259   : > { %v1088_v55 = vpop.f32.mrf.mxu0 }
 0x25a   : > { %v1557_v56 = vadd.f32 %v1088_v55, %v997_v54 }
 0x25b   : > { %v654_v57 = vpop.f32.mrf.mxu0 }
 0x25c   : > { %v1560_v58 = vmul.f32 0.70710677, %v1557_v56  ;;  %v1562_v59 = vadd.f32 %v997_v54, %v654_v57 }
 0x25d   : > { %v1091_v60 = vpop.f32.mrf.mxu0 }
 0x25e   : > { %v690_v61 = vand.u32 2147483647, %v1560_v58  ;;  %v1566_v62 = vmul.f32 0.70710677, %v1562_v59  ;;  %v1568_v63 = vadd.f32 %v1091_v60, %v997_v54  ;;  %vm682_vm2 = vcmp.ge.f32.partialorder %v1560_v58, 0.0 }
 0x25f   : > { %v664_v0 = vpop.f32.mrf.mxu0 }
 0x260   : > { %v694_v1 = vmul.f32 0.3275911, %v690_v61  ;;  %v689_v2 = vand.u32 2147483647, %v1566_v62  ;;  %v1572_v3 = vmul.f32 0.70710677, %v1568_v63  ;;  %v1574_v4 = vadd.f32 %v997_v54, %v664_v0 }
 0x261   : > { %v742_v18 = vsub.f32 0.0, %v690_v61  ;;  %vm681_vm3 = vcmp.ge.f32.partialorder %v1566_v62, 0.0  ;;  %v1002_v62 = vld [vmem:[%s1659_s4 + $0x3] ss:$0 sm:$0xff] }
 0x262   : > { %v698_v5 = vadd.f32 1.0, %v694_v1  ;;  %v693_v6 = vmul.f32 0.3275911, %v689_v2  ;;  %v692_v7 = vand.u32 2147483647, %v1572_v3  ;;  %v741_v20 = vsub.f32 0.0, %v689_v2 }
 0x263   : > { %v1578_v8 = vmul.f32 0.70710677, %v1574_v4  ;;  %v746_v21 = vmul.f32 %v742_v18, %v690_v61  ;;  %vm684_vm4 = vcmp.ge.f32.partialorder %v1572_v3, 0.0  ;;  %v673_v3 = vmul.f32 0.5, %v1562_v59 }
 0x264   : > { %1155 = vrcp.f32 %v698_v5  ;;  %v697_v9 = vadd.f32 1.0, %v693_v6  ;;  %v696_v10 = vmul.f32 0.3275911, %v692_v7  ;;  %v744_v22 = vsub.f32 0.0, %v692_v7 }
 0x265   : > { %v691_v12 = vand.u32 2147483647, %v1578_v8  ;;  %v745_v24 = vmul.f32 %v741_v20, %v689_v2  ;;  %v751_v26 = vmul.f32 1.442695, %v746_v21  ;;  %v1312_v20 = vmov -1.0  }
 0x266   : > { %1157 = vrcp.f32 %v697_v9  ;;  %v700_v16 = vadd.f32 1.0, %v696_v10  ;;  %v748_v28 = vmul.f32 %v744_v22, %v692_v7  ;;  %v686_v21 = vsel %vm682_vm2, 1.0, %v1312_v20 }
 0x267   : > { %v695_v17 = vmul.f32 0.3275911, %v691_v12  ;;  %v743_v27 = vsub.f32 0.0, %v691_v12  ;;  %v749_v32 = vmul.f32 1.442695, %v745_v24  ;;  %vm683_vm5 = vcmp.ge.f32.partialorder %v1578_v8, 0.0 }
 0x268   : > { %1159 = vrcp.f32 %v700_v16  ;;  %v755_v38 = vmul.f32 1.442695, %v748_v28  ;;  %v674_v28 = vmul.f32 0.5, %v1557_v56  ;;  %v675_v8 = vmul.f32 0.5, %v1574_v4 }
 0x269   : > { %v699_v19 = vadd.f32 1.0, %v695_v17  ;;  %v747_v35 = vmul.f32 %v743_v27, %v691_v12 }
 0x26b   : > { %1161 = vrcp.f32 %v699_v19  ;;  %v753_v45 = vmul.f32 1.442695, %v747_v35 }
 0x26c   : > { %1163 = vpow2.f32 %v751_v26 }
 0x26d   : > { %1165 = vpow2.f32 %v749_v32 }
 0x26e   : > { %1167 = vpow2.f32 %v755_v38 }
 0x26f   : > { %1169 = vpow2.f32 %v753_v45 }
 0x271   : > { %v1156_v23 = vpop.eup %1155 }
 0x272   : > { %v706_v25 = vmul.f32 1.0614054, %v1156_v23 }
 0x273   : > { %v1158_v29 = vpop.eup %1157 }
 0x274   : > { %v710_v30 = vadd.f32 -1.4531521, %v706_v25  ;;  %v705_v31 = vmul.f32 1.0614054, %v1158_v29 }
 0x275   : > { %v1160_v33 = vpop.eup %1159 }
 0x276   : > { %v714_v34 = vmul.f32 %v1156_v23, %v710_v30  ;;  %v709_v36 = vadd.f32 -1.4531521, %v705_v31  ;;  %v708_v37 = vmul.f32 1.0614054, %v1160_v33 }
 0x278   : > { %v718_v39 = vadd.f32 1.4214138, %v714_v34  ;;  %v1162_v40 = vpop.eup %1161  ;;  %v713_v41 = vmul.f32 %v1158_v29, %v709_v36  ;;  %v712_v42 = vadd.f32 -1.4531521, %v708_v37 }
 0x279   : > { %v707_v44 = vmul.f32 1.0614054, %v1162_v40  ;;  %v1164_v5 = vpop.eup %1163 }
 0x27a   : > { %v722_v43 = vmul.f32 %v1156_v23, %v718_v39  ;;  %v717_v46 = vadd.f32 1.4214138, %v713_v41  ;;  %v716_v47 = vmul.f32 %v1160_v33, %v712_v42  ;;  %v1166_v17 = vpop.eup %1165 }
 0x27b   : > { %v711_v49 = vadd.f32 -1.4531521, %v707_v44 }
 0x27c   : > { %v726_v48 = vadd.f32 -0.28449672, %v722_v43  ;;  %v721_v50 = vmul.f32 %v1158_v29, %v717_v46  ;;  %v720_v51 = vadd.f32 1.4214138, %v716_v47  ;;  %v676_v47 = vmul.f32 0.5, %v1568_v63 }
 0x27d   : > { %v715_v53 = vmul.f32 %v1162_v40, %v711_v49 }
 0x27e   : > { %v730_v52 = vmul.f32 %v1156_v23, %v726_v48  ;;  %v725_v54 = vadd.f32 -0.28449672, %v721_v50  ;;  %v724_v55 = vmul.f32 %v1160_v33, %v720_v51 }
 0x27f   : > { %v719_v60 = vadd.f32 1.4214138, %v715_v53 }
 0x280   : > { %v734_v57 = vadd.f32 0.2548296, %v730_v52  ;;  %v729_v61 = vmul.f32 %v1158_v29, %v725_v54  ;;  %v728_v0 = vadd.f32 -0.28449672, %v724_v55  ;;  %v797_v55 = vstv %s326_s15 }
 0x281   : > { %v723_v2 = vmul.f32 %v1162_v40, %v719_v60 }
 0x282   : > { %v738_v1 = vmul.f32 %v1156_v23, %v734_v57  ;;  %v733_v6 = vadd.f32 0.2548296, %v729_v61  ;;  %v732_v7 = vmul.f32 %v1160_v33, %v728_v0  ;;  %v1168_v23 = vpop.eup %1167 }
 0x283   : > { %v727_v10 = vadd.f32 -0.28449672, %v723_v2  ;;  %v1170_v32 = vpop.eup %1169 }
 0x284   : > { %v758_v9 = vmul.f32 %v1164_v5, %v738_v1  ;;  %v737_v12 = vmul.f32 %v1158_v29, %v733_v6  ;;  %v736_v16 = vadd.f32 0.2548296, %v732_v7  ;;  %v685_v29 = vsel %vm681_vm3, 1.0, %v1312_v20 }
 0x285   : > { %v731_v19 = vmul.f32 %v1162_v40, %v727_v10 }
 0x286   : > { %v762_v18 = vsub.f32 1.0, %v758_v9  ;;  %v757_v22 = vmul.f32 %v1166_v17, %v737_v12  ;;  %v740_v24 = vmul.f32 %v1160_v33, %v736_v16  ;;  %v688_v33 = vsel %vm684_vm4, 1.0, %v1312_v20 }
 0x287   : > { %v735_v26 = vadd.f32 0.2548296, %v731_v19 }
 0x288   : > { %v766_v25 = vmul.f32 %v762_v18, %v686_v21  ;;  %v761_v27 = vsub.f32 1.0, %v757_v22  ;;  %v760_v58 = vmul.f32 %v1168_v23, %v740_v24 }
 0x289   : > { %v739_v30 = vmul.f32 %v1162_v40, %v735_v26  ;;  %v687_v40 = vsel %vm683_vm5, 1.0, %v1312_v20 }
 0x28a   : > { %v770_v31 = vadd.f32 1.0, %v766_v25  ;;  %v765_v34 = vmul.f32 %v761_v27, %v685_v29  ;;  %v764_v35 = vsub.f32 1.0, %v760_v58 }
 0x28b   : > { %v759_v36 = vmul.f32 %v1170_v32, %v739_v30 }
 0x28c   : > { %v774_v37 = vmul.f32 %v770_v31, %v674_v28  ;;  %v768_v38 = vmul.f32 %v764_v35, %v688_v33  ;;  %v769_v39 = vadd.f32 1.0, %v765_v34 }
 0x28d   : > { %v763_v56 = vsub.f32 1.0, %v759_v36 }
 0x28e   : > { %v782_v41 = vmul.f32 %v1002_v62, %v774_v37  ;;  %v773_v42 = vmul.f32 %v769_v39, %v673_v3  ;;  %v772_v45 = vadd.f32 1.0, %v768_v38 }
 0x28f   : > { %v767_v43 = vmul.f32 %v763_v56, %v687_v40 }
 0x290   : > { %v788_v44 = vsel %vm335_vm0, %v782_v41, 0.0  ;;  %v781_v46 = vmul.f32 %v1002_v62, %v773_v42  ;;  %v776_v50 = vmul.f32 %v772_v45, %v676_v47 }
 0x291   : > { %789 = vadd.xlane.f32.xlu1 %v788_v44  ;;  %v771_v48 = vadd.f32 1.0, %v767_v43 }
 0x292   : > { %v785_v49 = vsel %vm335_vm0, %v781_v46, 0.0  ;;  %v784_v53 = vmul.f32 %v1002_v62, %v776_v50 }
 0x293   : > { %786 = vadd.xlane.f32.xlu0 %v785_v49  ;;  %v775_v59 = vmul.f32 %v771_v48, %v675_v8 }
 0x294   : > { %v794_v54 = vsel %vm335_vm0, %v784_v53, 0.0 }
 0x295   : > { %v783_v51 = vmul.f32 %v1002_v62, %v775_v59 }
 0x297   : > { %v791_v52 = vsel %vm335_vm0, %v783_v51, 0.0 }
 0x298   : > { %792 = vadd.xlane.f32.xlu0 %v791_v52 }
 0x29c   : > { %795 = vadd.xlane.f32.xlu0 %v794_v54 }
 0x31a   : > { %v790_v57 = vpop.xlane.xlu1 %789 }
 0x31b   : > { %v799_v60 = vadd.f32 %v797_v55, %v790_v57 }
 0x31c   : > { %v787_v63 = vpop.xlane.xlu0 %786 }
 0x31d   : > { %v798_v4 = vadd.f32 %v797_v55, %v787_v63 }
 0x31f   : > { %v802_v61 = vmax.f32 %v798_v4, %v799_v60 }
 0x321   : > { %v803_v0 = vrot.slane %v802_v61, 4  ;;  %v793_v1 = vpop.xlane.xlu0 %792 }
 0x322   : > { %v800_v7 = vadd.f32 %v797_v55, %v793_v1 }
 0x323   : > { %v804_v2 = vmax.f32 %v802_v61, %v803_v0 }
 0x325   : > { %v805_v5 = vrot.slane %v804_v2, 2  ;;  %v796_v6 = vpop.xlane.xlu0 %795 }
 0x326   : > { %v801_v9 = vadd.f32 %v797_v55, %v796_v6 }
 0x327   : > { %v806_v10 = vmax.f32 %v804_v2, %v805_v5 }
 0x328   : > { %v809_v12 = vmax.f32 %v800_v7, %v801_v9 }
 0x329   : > { %v807_v16 = vrot.slane %v806_v10, 1 }
 0x32a   : > { %v810_v17 = vrot.slane %v809_v12, 4 }
 0x32b   : > { %v808_v18 = vmax.f32 %v806_v10, %v807_v16 }
 0x32c   : > { %v811_v19 = vmax.f32 %v809_v12, %v810_v17 }
 0x32d   : > { %v816_v20 = vsub.f32 %v798_v4, %v808_v18  ;;  %v817_v21 = vsub.f32 %v799_v60, %v808_v18 }
 0x32e   : > { %v812_v22 = vrot.slane %v811_v19, 2 }
 0x32f   : > { %v820_v24 = vmul.f32 1.442695, %v816_v20  ;;  %v822_v23 = vmul.f32 1.442695, %v817_v21 }
 0x330   : > { %v813_v25 = vmax.f32 %v811_v19, %v812_v22 }
 0x331   : > { %1171 = vpow2.f32 %v820_v24 }
 0x332   : > { %1173 = vpow2.f32 %v822_v23  ;;  %v814_v26 = vrot.slane %v813_v25, 1 }
 0x334   : > { %v815_v27 = vmax.f32 %v813_v25, %v814_v26 }
 0x336   : > { %v818_v58 = vsub.f32 %v800_v7, %v815_v27  ;;  %v819_v28 = vsub.f32 %v801_v9, %v815_v27 }
 0x338   : > { %v824_v29 = vmul.f32 1.442695, %v818_v58  ;;  %v826_v30 = vmul.f32 1.442695, %v819_v28 }
 0x33a   : > { %1175 = vpow2.f32 %v824_v29 }
 0x33b   : > { %1177 = vpow2.f32 %v826_v30 }
 0x33e   : > { %v1172_v31 = vpop.eup %1171 }
 0x33f   : > { %v1174_v32 = vpop.eup %1173 }
 0x340   : > { %v828_v34 = vadd.f32 %v1174_v32, %v1172_v31 }
 0x342   : > { %v829_v35 = vrot.slane %v828_v34, 4 }
 0x344   : > { %v830_v62 = vadd.f32 %v829_v35, %v828_v34 }
 0x346   : > { %v831_v33 = vrot.slane %v830_v62, 2 }
 0x347   : > { %v1176_v36 = vpop.eup %1175 }
 0x348   : > { %v1178_v37 = vpop.eup %1177  ;;  %v832_v3 = vadd.f32 %v831_v33, %v830_v62 }
 0x349   : > { %v835_v38 = vadd.f32 %v1178_v37, %v1176_v36 }
 0x34a   : > { %v833_v39 = vrot.slane %v832_v3, 1 }
 0x34b   : > { %v836_v56 = vrot.slane %v835_v38, 4 }
 0x34c   : > { %v834_v41 = vadd.f32 %v833_v39, %v832_v3 }
 0x34d   : > { %v837_v40 = vadd.f32 %v836_v56, %v835_v38 }
 0x34e   : > { %1179 = vrcp.f32 %v834_v41 }
 0x34f   : > { %v838_v42 = vrot.slane %v837_v40, 2 }
 0x351   : > { %v839_v43 = vadd.f32 %v838_v42, %v837_v40 }
 0x353   : > { %v840_v44 = vrot.slane %v839_v43, 1 }
 0x355   : > { %v841_v45 = vadd.f32 %v840_v44, %v839_v43 }
 0x357   : > { %1181 = vrcp.f32 %v841_v45 }
 0x35b   : > { %v1180_v46 = vpop.eup %1179 }
 0x35c   : > { %v844_v47 = vmul.f32 %v1180_v46, %v834_v41 }
 0x35e   : > { %v846_v8 = vsub.f32 2.0, %v844_v47 }
 0x360   : > { %v848_v48 = vmul.f32 %v1180_v46, %v846_v8 }
 0x362   : > { %v850_v49 = vmul.f32 %v1172_v31, %v848_v48  ;;  %v851_v59 = vmul.f32 %v1174_v32, %v848_v48 }
 0x364   : > { %v1182_v50 = vpop.eup %1181  ;;  %v854_v51 = vmul.f32 %v850_v49, %v1503_v11  ;;  %v855_v52 = vmul.f32 %v851_v59, %v1508_v13 }
 0x365   : > { %v845_v53 = vmul.f32 %v1182_v50, %v841_v45 }
 0x366   : > { %858 = vst.msk [vmem:[%s304_s9] sm:$0xff] %vm335_vm0, %v854_v51  ;;  %859 = vst.msk [vmem:[%s304_s9 + $0x8] sm:$0xff] %vm335_vm0, %v855_v52 }
 0x367   : > { %v847_v54 = vsub.f32 2.0, %v845_v53 }
 0x369   : > { %v849_v55 = vmul.f32 %v1182_v50, %v847_v54 }
 0x36b   : > { %v852_v57 = vmul.f32 %v1176_v36, %v849_v55  ;;  %v853_v63 = vmul.f32 %v1178_v37, %v849_v55 }
 0x36d   : > { %v856_v11 = vmul.f32 %v852_v57, %v1510_v14  ;;  %v857_v13 = vmul.f32 %v853_v63, %v1516_v15 }
 0x36f   : > { %860 = vst.msk [vmem:[%s304_s9 + $0x10] sm:$0xff] %vm335_vm0, %v856_v11  ;;  %861 = vst.msk [vmem:[%s304_s9 + $0x18] sm:$0xff] %vm335_vm0, %v857_v13 }
 0x370   : > { %1250 = shalt.err (!%p1247_p5)
}
 0x371   : > { %s1251_s22 = scalar_lea.hbm %s1606_s20, 512  ;;  %s1255_s28 = scalar_lea.hbm %s1661_s6, 1024 }
 0x372   : > { %p1252_p2 = scmp.ne.s32.totalorder %s1606_s20, %s1251_s22  ;;  %p1256_p6 = scmp.lt.s32.totalorder %s1606_s20, %s1661_s6 }
 0x373   : > { %p1257_p8 = scmp.lt.s32.totalorder %s1255_s28, %s1251_s22 }
 0x374   : > { %p1253_p1 = pnand %p1252_p2, %p1679_p7 }
 0x375   : > { %p1258_p3 = por %p1257_p8, %p1256_p6 }
 0x376   : > { %p1254_p4 = pneg %p1253_p1 }
 0x378   : > { %p1259_p11 = pnand %p1258_p3, %p1254_p4 }
 0x37a   : > { %1262 = shalt.err (!%p1259_p11)
}
 0x37b   : > { %s1314_s11 = smov 128   ;;  %s1315_s27 = smov 8  }
 0x37c   : > { %1098 = dma.vmem_to_hbm [thread:$0]  (%p1679_p7), %s1608_s13, 512, %s1606_s20, %s863_s5, %s1314_s11, %s1314_s11, %s1315_s27  }
 0x37d PF: > { %s892_s7 = sand.u32 1, %s1293_s23   ;;  %p1680_p9 = scmp.ne.s32.totalorder %s1668_s29, 0 }
 0x37e   : > { %p1681_p10 = scmp.ge.s32.totalorder %s1305_s26, 2  ;;  %s893_s14 = scalar_lea.sflag [#allocation5], %s892_s7 }
 0x380   : > { %p1109_p12 = pnand %p1681_p10, %p1680_p9 }
 0x382   : > { %p1110_p13 = pneg %p1109_p12 }
 0x384   : > { %1288 = dma.done.wait (%p1110_p13), %s893_s14, 512  }
 0x385   : > { %1290 = vsyncadd (%p1110_p13), %s893_s14, 4294966784  ;;  %p21_p0 = scmp.ge.s32.totalorder %s1408_s10, 4   ;;  %s1682_s23 = smov %s1297_s24 }
 0x386   : > { %s1683_s24 = smov %s1301_s25  ;;  %s1684_s25 = smov %s1428_s18 }
 0x387   : > { %s1685_s26 = smov %s1408_s10  ;;  %23 = sbr.rel (!%p21_p0) target bundleno = 8 (0x8), region = 97 }
 0x38c   :  { %898 = vsyncpa [#allocation4], 1 }
 0x38d   :  { %900 = vsyncpa [#allocation4 + $0x1], 1 }
 0x38e   :  { %901 = vsyncpa [#allocation7], 1 }
 0x38f   :  { %902 = vsyncpa [#allocation5], 1 }
 0x390   :  { %904 = vsyncpa [#allocation5 + $0x1], 1 }

</bundles_post_ra>
